<compile_context>
chip_gen: v6e
topology: v6e:2x2x1
jax: 0.10.0
libtpu: 0.0.40
codegen_flags: <defaults>
</compile_context>

<pallas_src>
from functools import partial

import jax
import jax.numpy as jnp
from jax.experimental import pallas as pl
from jax.experimental.pallas import tpu as pltpu


def _round_up(a, b):
    return -(-a // b) * b


def _rbf_kernel(x1_ref, x2t_ref, x2hn_ref, o_ref, *, x1_eq_x2, tn, tm, precision):
    """Computes one (tn, tm) tile of exp(-clamp(sqdist, 0) / 2).

    x1_ref  : (tn, D)  centered, scaled x1 row tile
    x2t_ref : (D, tm)  centered, scaled x2 column tile (pre-transposed, lane-major)
    x2hn_ref: (1, tm)  precomputed 0.5 * ||x2 row||^2 (lane-major)
    o_ref   : (tn, tm) output tile
    """
    x1 = x1_ref[...]

    # Cross term on the MXU: (tn, D) @ (D, tm).
    cross = jnp.dot(x1, x2t_ref[...], preferred_element_type=jnp.float32,
                    precision=precision)

    # Half row norms of x1 computed in-kernel (VPU square + XLU lane-reduce on
    # data already in VMEM; saves a per-step (tn,1) DMA stream).
    x1hn = 0.5 * jnp.sum(x1 * x1, axis=-1, keepdims=True)          # (tn, 1)

    # Folded form: exp(-max(|a|^2+|b|^2-2ab, 0)/2) == exp(min(ab - |a|^2/2 - |b|^2/2, 0))
    t = cross - x1hn - x2hn_ref[...]

    def _store(tv):
        o_ref[...] = jnp.exp(jnp.minimum(tv, 0.0)).astype(o_ref.dtype)

    if x1_eq_x2:
        # diag(sqdist) = 0  =>  diag(out) = exp(0) = 1 exactly.  Mask t before
        # the exp so every tile does exactly one store (no o_ref read-back);
        # only blocks intersecting the global diagonal pay for the iota/select.
        row0 = pl.program_id(0) * tn
        col0 = pl.program_id(1) * tm
        intersects = jnp.logical_and(row0 < col0 + tm, col0 < row0 + tn)

        @pl.when(intersects)
        def _():
            rows = jax.lax.broadcasted_iota(jnp.int32, (tn, tm), 0) + row0
            cols = jax.lax.broadcasted_iota(jnp.int32, (tn, tm), 1) + col0
            _store(jnp.where(rows == cols, 0.0, t))

        @pl.when(jnp.logical_not(intersects))
        def _():
            _store(t)
    else:
        _store(t)


def generate_rbfcov_forward(x1, x2, raw_lengthscale=0.0, *, x1_eq_x2=None,
                            tn=512, tm=1024, out_dtype=jnp.float32,
                            precision=jax.lax.Precision.HIGHEST):
    """JAX/Pallas equivalent of generate_rbfcov(raw_lengthscale)(x1, x2)."""
    x1 = jnp.asarray(x1, jnp.float32)
    x2 = jnp.asarray(x2, jnp.float32)

    # torch.equal(x1, x2) replacement. For concrete arrays we do a real value
    # comparison (matches torch.equal); under jit the values are tracers, so
    # fall back to object identity / the explicit caller flag.
    # TODO(synk): under jax.jit, equal-valued but distinct tracers cannot be
    # detected statically -> pass x1_eq_x2=True explicitly in that case.
    if x1_eq_x2 is None:
        if x1 is x2:
            x1_eq_x2 = True
        elif x1.shape != x2.shape:
            x1_eq_x2 = False
        else:
            try:
                x1_eq_x2 = bool(jnp.array_equal(x1, x2))
            except jax.errors.ConcretizationTypeError:
                x1_eq_x2 = False
    x1_eq_x2 = bool(x1_eq_x2)

    lengthscale = jnp.exp(jnp.asarray(raw_lengthscale, jnp.float32))
    x1_ = x1 / lengthscale
    x2_ = x2 / lengthscale

    # mean-centering adjustment (tiny reduction: plain JAX glue)
    adjustment = jnp.mean(x1_, axis=-2, keepdims=True)
    x1c = x1_ - adjustment
    x2c = x2_ - adjustment

    N, D = x1c.shape
    M, D2 = x2c.shape
    assert D == D2, "feature dims must match"

    # x2 half-norms precomputed once (lane-major (1, M)); x2 pre-transposed so
    # the MXU rhs is already (D, tm) lane-major (no in-kernel transpose).
    x2hn = 0.5 * jnp.sum(x2c * x2c, axis=-1, keepdims=True).T      # (1, M)
    x2t = x2c.T                                                    # (D, M)

    # ---- Tile selection: large, sublane/lane-aligned, VMEM-budgeted ----
    out_itemsize = jnp.dtype(out_dtype).itemsize
    tn = int(min(int(tn), _round_up(N, 8)))
    tm = int(min(int(tm), _round_up(M, 128)))
    tn = max(8, _round_up(tn, 8))
    tm = max(128, _round_up(tm, 128))

    def _footprint(tn_, tm_):
        # double-buffered: x1 tile + x2^T tile + x2 half-norm tile + out tile
        return 2 * (tn_ * D * 4 + D * tm_ * 4 + tm_ * 4 + tn_ * tm_ * out_itemsize)

    # ~36 MiB double-buffered budget fits every generation (v7x physical VMEM
    # is 64 MiB); shrink tm first (keeps the M axis lane-dense), then tn.
    VMEM_TILE_BUDGET = 36 << 20
    while _footprint(tn, tm) > VMEM_TILE_BUDGET and tm > 128:
        tm = max(128, (tm // 2 // 128) * 128)
    while _footprint(tn, tm) > VMEM_TILE_BUDGET and tn > 8:
        tn = max(8, (tn // 2 // 8) * 8)
    # TODO(synk): for very large D (>~2k) a K-tiled grid axis with a VMEM f32
    # accumulator would keep tn/tm large instead of shrinking them here.

    grid_i = pl.cdiv(N, tn)
    grid_j = pl.cdiv(M, tm)

    vmem_limit = int(min(max(_footprint(tn, tm) + (16 << 20), 32 << 20), 60 << 20))

    cost = pl.CostEstimate(
        flops=2 * N * M * D,
        transcendentals=N * M,
        bytes_accessed=int(4 * N * D + 4 * grid_i * (D + 1) * M
                           + out_itemsize * N * M),
    )

    # No padding / output slicing: grid uses pl.cdiv, edge tiles are partial
    # (out-of-bounds reads feed only out-of-bounds outputs, whose writes are
    # dropped), so out_shape is exactly (N, M) and there is no extra HBM copy.
    out = pl.pallas_call(
        partial(_rbf_kernel, x1_eq_x2=x1_eq_x2, tn=tn, tm=tm, precision=precision),
        out_shape=jax.ShapeDtypeStruct((N, M), out_dtype),
        grid=(grid_i, grid_j),
        in_specs=[
            pl.BlockSpec((tn, D), lambda i, j: (i, 0)),    # x1 row tile
            pl.BlockSpec((D, tm), lambda i, j: (0, j)),    # x2^T column tile
            pl.BlockSpec((1, tm), lambda i, j: (0, j)),    # x2 half-norms
        ],
        out_specs=pl.BlockSpec((tn, tm), lambda i, j: (i, j)),
        compiler_params=pltpu.CompilerParams(
            dimension_semantics=("parallel", "parallel"),
            vmem_limit_bytes=vmem_limit),
        cost_estimate=cost,
    )(x1c, x2t, x2hn)

    # scale = 1
    return out


def _reference(x1, x2, raw_lengthscale, x1_eq_x2):
    """Pure-JAX reference of the PyTorch forward, for correctness checking."""
    ls = jnp.exp(jnp.asarray(raw_lengthscale, jnp.float32))
    x1_, x2_ = x1 / ls, x2 / ls
    adj = jnp.mean(x1_, axis=-2, keepdims=True)
    a, b = x1_ - adj, x2_ - adj
    sq = (jnp.sum(a * a, -1, keepdims=True)
          + jnp.sum(b * b, -1, keepdims=True).T
          - 2.0 * jnp.dot(a, b.T, precision=jax.lax.Precision.HIGHEST))
    if x1_eq_x2:
        eye = jnp.eye(sq.shape[0], sq.shape[1], dtype=sq.dtype)
        sq = sq * (1.0 - eye)
    sq = jnp.maximum(sq, 0.0)
    return jnp.exp(-0.5 * sq)


if __name__ == "__main__":
    key = jax.random.PRNGKey(0)
    k1, k2, k3, k4 = jax.random.split(key, 4)

    raw_lengthscale = 0.0  # deterministic parameter init, as in __init__

    # --- Case 1: small shapes, x1 != x2 ---
    N, M, D = 16, 16, 8
    x1 = jax.random.normal(k1, (N, D), dtype=jnp.float32)
    x2 = jax.random.normal(k2, (M, D), dtype=jnp.float32)

    res = generate_rbfcov_forward(x1, x2, raw_lengthscale)
    jax.block_until_ready(res)
    ref = _reference(x1, x2, raw_lengthscale, x1_eq_x2=False)
    assert res.shape == (N, M)
    assert bool(jnp.allclose(res, ref, rtol=1e-4, atol=1e-5))
    assert bool(jnp.all(res >= 0.0)) and bool(jnp.all(res <= 1.0 + 1e-6))

    # --- Case 2: x1 == x2 (zeroed-diagonal branch -> exact unit diagonal) ---
    res_sym = generate_rbfcov_forward(x1, x1, raw_lengthscale)
    jax.block_until_ready(res_sym)
    ref_sym = _reference(x1, x1, raw_lengthscale, x1_eq_x2=True)
    assert bool(jnp.allclose(res_sym, ref_sym, rtol=1e-4, atol=1e-5))
    assert bool(jnp.allclose(jnp.diagonal(res_sym), 1.0))

    # equal values but distinct arrays: value comparison path (torch.equal)
    res_sym2 = generate_rbfcov_forward(x1, jnp.array(x1), raw_lengthscale)
    jax.block_until_ready(res_sym2)
    assert bool(jnp.allclose(jnp.diagonal(res_sym2), 1.0))

    # --- Case 3: non-aligned shapes (exercise partial edge tiles, no padding) ---
    N2, M2, D2 = 40, 72, 12
    a = jax.random.normal(k3, (N2, D2), dtype=jnp.float32)
    b = jax.random.normal(k4, (M2, D2), dtype=jnp.float32)
    r2 = generate_rbfcov_forward(a, b, 0.3)
    jax.block_until_ready(r2)
    ref2 = _reference(a, b, 0.3, x1_eq_x2=False)
    assert r2.shape == (N2, M2)
    assert bool(jnp.allclose(r2, ref2, rtol=1e-4, atol=1e-5))

    print("KERNEL_OK")
</pallas_src>

<mosaic_0001>
module attributes {stable_mosaic.version = 11 : i64} {
  func.func @_rbf_kernel(%arg0: i32, %arg1: i32, %arg2: memref<16x8xf32, #tpu.memory_space<vmem>>, %arg3: memref<8x128xf32, #tpu.memory_space<vmem>>, %arg4: memref<1x128xf32, #tpu.memory_space<vmem>>, %arg5: memref<16x128xf32, #tpu.memory_space<vmem>>) attributes {dimension_semantics = [#tpu.dimension_semantics<parallel>, #tpu.dimension_semantics<parallel>], iteration_bounds = array<i64: 1, 1>, scalar_prefetch = 0 : i64, scratch_operands = 0 : i64, tpu.core_type = #tpu.core_type<tc>, window_params = [{transform_indices = @transform_0, window_bounds = array<i64: 16, 8>}, {transform_indices = @transform_1, window_bounds = array<i64: 8, 128>}, {transform_indices = @transform_2, window_bounds = array<i64: 1, 128>}, {transform_indices = @transform_3, window_bounds = array<i64: 16, 128>}]} {
    %c0 = arith.constant 0 : index
    %c0_0 = arith.constant 0 : index
    %0 = vector.load %arg2[%c0, %c0_0] : memref<16x8xf32, #tpu.memory_space<vmem>>, vector<16x8xf32>
    %c0_1 = arith.constant 0 : index
    %c0_2 = arith.constant 0 : index
    %1 = vector.load %arg3[%c0_1, %c0_2] : memref<8x128xf32, #tpu.memory_space<vmem>>, vector<8x128xf32>
    %cst = arith.constant dense<0.000000e+00> : vector<16x128xf32>
    %2 = tpu.matmul %0, %1, %cst {dimension_numbers = #tpu.dot_dimension_numbers<[1], [0], [0], [1], [0, 0, 1, 1], [], []>, precision = #tpu.contract_precision<fp32>} : vector<16x8xf32>, vector<8x128xf32>, vector<16x128xf32> -> vector<16x128xf32>
    %3 = arith.mulf %0, %0 : vector<16x8xf32>
    %cst_3 = arith.constant dense<0.000000e+00> : vector<16xf32>
    %4 = vector.multi_reduction <add>, %3, %cst_3 [1] : vector<16x8xf32> to vector<16xf32>
    %5 = vector.shape_cast %4 : vector<16xf32> to vector<16x1xf32>
    %cst_4 = arith.constant 5.000000e-01 : f32
    %6 = vector.broadcast %cst_4 : f32 to vector<16x1xf32>
    %7 = arith.mulf %6, %5 : vector<16x1xf32>
    %8 = vector.broadcast %7 : vector<16x1xf32> to vector<16x128xf32>
    %9 = arith.subf %2, %8 : vector<16x128xf32>
    %c0_5 = arith.constant 0 : index
    %c0_6 = arith.constant 0 : index
    %10 = vector.load %arg4[%c0_5, %c0_6] : memref<1x128xf32, #tpu.memory_space<vmem>>, vector<1x128xf32>
    %11 = vector.broadcast %10 : vector<1x128xf32> to vector<16x128xf32>
    %12 = arith.subf %9, %11 : vector<16x128xf32>
    %cst_7 = arith.constant 0.000000e+00 : f32
    %13 = vector.broadcast %cst_7 : f32 to vector<16x128xf32>
    %14 = arith.minimumf %12, %13 : vector<16x128xf32>
    %15 = math.exp %14 : vector<16x128xf32>
    %c0_8 = arith.constant 0 : index
    %c0_9 = arith.constant 0 : index
    %16 = vector.load %arg5[%c0_8, %c0_9] : memref<16x128xf32, #tpu.memory_space<vmem>>, vector<16x128xf32>
    tpu.vector_store %arg5[%c0_8, %c0_9], %15 {strides = array<i32>} : memref<16x128xf32, #tpu.memory_space<vmem>>, vector<16x128xf32>,
    return
  }
  func.func @transform_0(%arg0: i32, %arg1: i32) -> (i32, i32) {
    %c0_i32 = arith.constant 0 : i32
    %c0_i32_0 = arith.constant 0 : i32
    return %arg0, %c0_i32 : i32, i32
  }
  func.func @transform_1(%arg0: i32, %arg1: i32) -> (i32, i32) {
    %c0_i32 = arith.constant 0 : i32
    %c0_i32_0 = arith.constant 0 : i32
    return %c0_i32, %arg1 : i32, i32
  }
  func.func @transform_2(%arg0: i32, %arg1: i32) -> (i32, i32) {
    %c0_i32 = arith.constant 0 : i32
    %c0_i32_0 = arith.constant 0 : i32
    return %c0_i32, %arg1 : i32, i32
  }
  func.func @transform_3(%arg0: i32, %arg1: i32) -> (i32, i32) {
    %c0_i32 = arith.constant 0 : i32
    return %arg0, %arg1 : i32, i32
  }
}

</mosaic_0001>

<bundles_post_ra>
// kernel: tpu_custom_call.1
= control target key start
LH: loop header
LB: loop body
LE: loop exit
PB: predicated region body
PF: predicated region fallthrough
CT: control target
= control target key end

     0   :  { %vm18_vm0 = vcmask 64512   ;;  %s679_s0 = inlined_call_operand.vmem [shape: f32[16,8], index: 0, kind: input, shape index: {}]   ;;  %s680_s1 = inlined_call_operand.vmem [shape: f32[8,16], index: 1, kind: input, shape index: {}]   ;;  %s681_s2 = inlined_call_operand.vmem [shape: f32[1,16], index: 2, kind: input, shape index: {}]   ;;  %s682_s3 = inlined_call_operand.hbm [shape: f32[16,16], index: 3, kind: output, shape index: {}]  }
   0x1   :  { %v17_v0 = vld [vmem:[%s680_s1] sm:$0xff]  ;;  %v16_v2 = vld [vmem:[%s679_s0 + $0x8] sm:$0xff] }
   0x2   :  { %v15_v1 = vld [vmem:[%s679_s0] sm:$0xff]  ;;  %v56_v3 = vand.u32 4294901760, %v17_v0  ;;  %v23_v5 = vsel %vm18_vm0, %v16_v2, 0 }
   0x3   :  { %v20_v4 = vsel %vm18_vm0, %v15_v1, 0  ;;  %v514_v6 = vmul.f32 %v15_v1, %v15_v1 }
   0x4   :  { %8 = vsyncpa [#allocation3], 0  ;;  %v91_v7 = vand.u32 4294901760, %v20_v4  ;;  %v101_v8 = vand.u32 4294901760, %v23_v5  ;;  %v515_v9 = vmul.f32 %v16_v2, %v16_v2  ;;  %578 = vmatprep.subr.mxu0 %v56_v3  ;;  %v143_v10 = vsub.f32 %v17_v0, %v56_v3  ;;  %v559_v47 = vld [vmem:[%s681_s2] ss:$0 sm:$0xff] }
   0x5   :  { %v516_v11 = vsel %vm18_vm0, %v514_v6, 0.0  ;;  %579 = vmatpush3.msra.mxu0 %v56_v3  ;;  %s637_s18 = smov [#allocation2]  }
   0x6   :  { %v92_v12 = vsub.f32 %v20_v4, %v91_v7  ;;  %585 = vmatprep.mubr.f32.mxu1 %v91_v7  ;;  %v102_v13 = vsub.f32 %v23_v5, %v101_v8  ;;  %v144_v14 = vand.u32 4294901760, %v143_v10  ;;  %588 = vmatprep.subr.mxu0 %v143_v10  ;;  %v519_v17 = vsel %vm18_vm0, %v515_v9, 0.0  ;;  %s548_s19 = sshll.u32 %s637_s18, 4  ;;  %s549_s19 = int_to_ptr.vmem [resolvable:$true] %s548_s19 }
   0x7   :  { %517 = vadd.xlane.f32.xlu0 %v516_v11  ;;  %s615_s2 = scalar_lea.vmem %s549_s19, 256  ;;  %p620_p1 = scmp.lt.s32.totalorder %s549_s19, %s549_s19 }
   0x8   :  { %v93_v15 = vand.u32 4294901760, %v92_v12  ;;  %v103_v16 = vand.u32 4294901760, %v102_v13  ;;  %v145_v18 = vsub.f32 %v143_v10, %v144_v14  ;;  %p616_p0 = scmp.ne.s32.totalorder %s549_s19, %s615_s2  ;;  %p621_p2 = scmp.lt.s32.totalorder %s615_s2, %s615_s2 }
   0xa   :  { %v94_v19 = vsub.f32 %v92_v12, %v93_v15  ;;  %v104_v20 = vsub.f32 %v102_v13, %v103_v16  ;;  %v146_v21 = vand.u32 4294901760, %v145_v18  ;;  %p622_p3 = por %p621_p2, %p620_p1 }
   0xb   :  { %520 = vadd.xlane.f32.xlu0 %v519_v17 }
   0xc   :  { %v95_v22 = vand.u32 4294901760, %v94_v19  ;;  %v105_v23 = vand.u32 4294901760, %v104_v20  ;;  %583 = vmatprep.subr.mxu1 %v146_v21  ;;  %p623_p4 = pnand %p622_p3, %p616_p0 }
   0xd   :  { %584 = vmatpush3.msra.mxu1 %v146_v21 }
   0xe   :  { %580 = vmatprep.mubr.f32.mxu0 %v95_v22  ;;  %586 = vmatmul.mubr.f32.vlgmr.msra.gmra.mxu1 %v101_v8 }
   0xf   :  { %581 = vmatmul.mubr.f32.vlgmr.msra.gmra.mxu0 %v105_v23  ;;  %593 = vmatprep.subr.mxu1 %v56_v3 }
  0x10   :  { %589 = vmatpush3.msra.mxu0 %v143_v10  ;;  %594 = vmatpush3.msra.mxu1 %v56_v3 }
  0x11   :  { %590 = vmatprep.mubr.f32.mxu0 %v92_v12  ;;  %595 = vmatprep.mubr.f32.mxu1 %v93_v15 }
  0x12   :  { %598 = vmatprep.subr.mxu0 %v144_v14  ;;  %596 = vmatmul.mubr.f32.vlgmr.msra.gmra.mxu1 %v103_v16 }
  0x13   :  { %591 = vmatmul.mubr.f32.vlgmr.msra.gmra.mxu0 %v102_v13  ;;  %603 = vmatprep.subr.mxu1 %v56_v3 }
  0x14   :  { %599 = vmatpush3.msra.mxu0 %v144_v14  ;;  %604 = vmatpush3.msra.mxu1 %v56_v3 }
  0x15   :  { %600 = vmatprep.mubr.f32.mxu0 %v91_v7  ;;  %605 = vmatprep.mubr.f32.mxu1 %v91_v7 }
  0x16   :  { %606 = vmatmul.mubr.f32.vlgmr.msra.gmra.mxu1 %v101_v8 }
  0x17   :  { %601 = vmatmul.mubr.f32.vlgmr.msra.gmra.mxu0 %v101_v8 }
  0x90   :  { %v518_v24 = vpop.xlane.xlu0 %517 }
  0x91   :  { %v522_v49 = vmul.f32 0.5, %v518_v24 }
  0x94   :  { %v521_v34 = vpop.xlane.xlu0 %520 }
  0x95   :  { %v523_v43 = vmul.f32 0.5, %v521_v34 }
  0xce   :  { %v587_v26 = vpop.f32.mrf.mxu1 }
  0xcf   :  { %v582_v25 = vpop.f32.mrf.mxu0 }
  0xd0   :  { %v183_v28 = vpop.f32.mrf.mxu1  ;;  %v190_v29 = vadd.f32 %v587_v26, %v582_v25 }
  0xd1   :  { %v97_v27 = vpop.f32.mrf.mxu0 }
  0xd2   :  { %v597_v31 = vpop.f32.mrf.mxu1  ;;  %v184_v32 = vadd.f32 %v183_v28, %v97_v27 }
  0xd3   :  { %v592_v30 = vpop.f32.mrf.mxu0 }
  0xd4   :  { %v271_v33 = vadd.f32 %v592_v30, %v190_v29  ;;  %v344_v36 = vpop.f32.mrf.mxu1 }
  0xd5   :  { %v263_v35 = vpop.f32.mrf.mxu0 }
  0xd6   :  { %v353_v37 = vadd.f32 %v597_v31, %v271_v33  ;;  %v264_v38 = vadd.f32 %v263_v35, %v184_v32  ;;  %v607_v40 = vpop.f32.mrf.mxu1 }
  0xd7   :  { %v602_v39 = vpop.f32.mrf.mxu0 }
  0xd8   :  { %v345_v41 = vadd.f32 %v344_v36, %v264_v38  ;;  %v433_v42 = vadd.f32 %v602_v39, %v353_v37  ;;  %v504_v48 = vpop.f32.mrf.mxu1 }
  0xd9   :  { %v426_v44 = vpop.f32.mrf.mxu0 }
  0xda   :  { %v511_v45 = vadd.f32 %v607_v40, %v433_v42  ;;  %v427_v46 = vadd.f32 %v426_v44, %v345_v41 }
  0xdc   :  { %v525_v50 = vsub.f32 %v511_v45, %v523_v43  ;;  %v505_v51 = vadd.f32 %v504_v48, %v427_v46 }
  0xde   :  { %v534_v52 = vsub.f32 %v525_v50, %v559_v47  ;;  %v524_v53 = vsub.f32 %v505_v51, %v522_v49 }
  0xe0   :  { %v536_v54 = vmin.f32 %v534_v52, 0.0  ;;  %v533_v55 = vsub.f32 %v524_v53, %v559_v47 }
  0xe2   :  { %v539_v56 = vmul.f32 1.442695, %v536_v54  ;;  %v535_v57 = vmin.f32 %v533_v55, 0.0 }
  0xe4   :  { %611 = vpow2.f32 %v539_v56  ;;  %v537_v58 = vmul.f32 1.442695, %v535_v57 }
  0xe6   :  { %613 = vpow2.f32 %v537_v58 }
  0xf1   :  { %v612_v59 = vpop.eup %611 }
  0xf2   :  { %542 = vst [vmem:[#allocation2 + $0x8] sm:$0xff] %v612_v59 }
  0xf3   :  { %v614_v60 = vpop.eup %613 }
  0xf4   :  { %541 = vst [vmem:[#allocation2] sm:$0xff] %v614_v60 }
  0xf5   :  { %626 = shalt.err (!%p623_p4)
}
  0xf6   :  { %s638_s20 = smov 128   ;;  %s639_s21 = smov 8  }
  0xf7   :  { %554 = dma.vmem_to_hbm [thread:$0]  %s549_s19, 256, %s682_s3, [#allocation3], %s638_s20, %s638_s20, %s639_s21  }
  0xf8   :  { %635 = dma.done.wait [#allocation3], 256  }
  0xf9   :  { %636 = vsyncadd [#allocation3], 4294967040 }
  0xfa   :  { %558 = vsyncpa [#allocation3], 1 }

</bundles_post_ra>
